<compile_context>
chip_gen: v6e
topology: v6e:2x2x1
jax: 0.10.0
libtpu: 0.0.40
codegen_flags: <defaults>
</compile_context>

<pallas_src>
import jax
import jax.numpy as jnp
from jax.experimental import pallas as pl
from jax.experimental.pallas import tpu as pltpu


_LANE = 128


def _bridge_add_kernel(x1_ref, x2_ref, out_ref):
    # Elementwise add of the two (tile_rows, cols) VMEM tiles (VPU only).
    out_ref[...] = (x1_ref[...] + x2_ref[...]).astype(out_ref.dtype)


def _round_up(x, m):
    return ((x + m - 1) // m) * m


def _sublane_multiple(dtype):
    # Sublane packing: f32 -> 8 rows/vreg, bf16 -> 16, int8/fp8 -> 32.
    return {4: 8, 2: 16, 1: 32}.get(jnp.dtype(dtype).itemsize, 8)


def _per_buffer_budget_bytes():
    """Per-input VMEM tile budget, generation-aware (best effort)."""
    try:
        vmem = getattr(pltpu.get_tpu_info(), "vmem_capacity_bytes", None)
    except Exception:
        vmem = None
    if vmem is not None and vmem <= 64 * 1024 * 1024:
        # v7x: 64 MiB VMEM/TC but ~3.2 TB/s HBM -> larger tiles amortize the
        # per-step overhead.  6 double-buffered tiles * 4 MiB = 24 MiB, safe.
        return 4 * 1024 * 1024
    # v5e/v6e (128 MiB physical; v5e default scoped VMEM is only 16 MiB):
    # 2 MiB/buffer -> 12 MiB footprint, already ~85% of the HBM roofline.
    return 2 * 1024 * 1024


def _lane_dense_cols(n):
    """Widest lane-dense column count that exactly factors n (or None)."""
    for cols in (2048, 1024, 512, 256, 128):
        if n % cols == 0:
            return cols
    return None


def _pick_tile_rows(rows, cols, itemsize, sublane):
    """Row tile: budget-sized, sublane-rounded, even step count when split."""
    budget = _per_buffer_budget_bytes()
    budget_rows = max(sublane, (budget // (cols * itemsize)) // sublane * sublane)
    if rows <= sublane:
        return rows  # single full-extent block (block dim == array dim is legal)
    tile = min(budget_rows, _round_up(rows, sublane))
    steps = pl.cdiv(rows, tile)
    if steps > 1 and steps % 2 == 1:
        # v7x megacore: the "parallel" axis is sharded across 2 TensorCores; an
        # odd step count leaves one core with extra tiles.  Nudge to an even
        # count when sublane rounding still yields one (harmless on 1-TC chips).
        cand = _round_up(pl.cdiv(rows, steps + 1), sublane)
        if cand >= sublane and pl.cdiv(rows, cand) % 2 == 0:
            tile = cand
    return tile


def bridge_attention_pooling(x1, x2, w1=None, b1=None, w2=None, *,
                             min_pallas_bytes=4 * 1024 * 1024,
                             force_pallas=False,
                             donate_x1=False):
    """Forward of BridgeModule(bridge_type='attention_pooling').

    w1 / b1 / w2 (the attention MLP parameters) are accepted for API parity but
    cannot influence the result for finite inputs: the size-1 softmax makes the
    attention weights exactly 1.0, so out == x1 + x2 bit-for-bit.
    """
    assert x1.shape == x2.shape and x1.dtype == x2.dtype
    orig_shape = x1.shape
    n = x1.size
    itemsize = jnp.dtype(x1.dtype).itemsize
    total_bytes = 3 * n * itemsize
    cols = _lane_dense_cols(n)

    # Fast path: XLA fuses a plain add into producers/consumers (no extra HBM
    # round trip, no custom-call / per-step overhead).  Also used when n is not
    # a multiple of 128: a lane-dense Pallas layout would need a materialized
    # pad copy across the fusion barrier, costing more than it saves for a
    # purely memory-bound add.
    if cols is None or (not force_pallas and total_bytes < min_pallas_bytes):
        return x1 + x2

    rows = n // cols
    a = x1.reshape(rows, cols)   # contiguous reshape: free in XLA
    b = x2.reshape(rows, cols)
    sublane = _sublane_multiple(x1.dtype)
    tile = _pick_tile_rows(rows, cols, itemsize, sublane)
    grid = (pl.cdiv(rows, tile),)   # ragged tail block is masked by Pallas

    tile_bytes = tile * cols * itemsize
    # 3 arrays (x1/x2/out), double-buffered, plus headroom; capped well under
    # v7x's 64 MiB physical VMEM, raises v5e's 16 MiB default when needed.
    vmem_limit = min(3 * 2 * tile_bytes + (8 << 20), 48 << 20)

    spec = pl.BlockSpec((tile, cols), lambda i: (i, 0))
    out = pl.pallas_call(
        _bridge_add_kernel,
        out_shape=jax.ShapeDtypeStruct((rows, cols), x1.dtype),
        grid_spec=pltpu.PrefetchScalarGridSpec(
            num_scalar_prefetch=0,
            grid=grid,
            in_specs=[spec, spec],
            out_specs=spec),
        compiler_params=pltpu.CompilerParams(
            dimension_semantics=("parallel",),
            vmem_limit_bytes=vmem_limit),
        cost_estimate=pl.CostEstimate(
            flops=n, transcendentals=0, bytes_accessed=total_bytes),
        input_output_aliases=({0: 0} if donate_x1 else {}),
    )(a, b)
    return out.reshape(orig_shape)


def bridge_reference(x1, x2, w1, b1, w2):
    """Faithful pure-JAX translation of the PyTorch module (attention1 reused)."""
    def attn(x):
        h = jnp.maximum(x @ w1 + b1, 0.0)
        s = h @ w2                               # (B, 1)
        return jax.nn.softmax(s, axis=-1)        # softmax over size-1 dim -> 1.0
    return attn(x1) * x1 + attn(x2) * x2


if __name__ == "__main__":
    def make_params(key, D, A, dtype):
        k_w1, k_b1, k_w2 = jax.random.split(key, 3)
        w1 = (jax.random.normal(k_w1, (D, A), jnp.float32) * 0.1).astype(dtype)
        b1 = (jax.random.normal(k_b1, (A,), jnp.float32) * 0.1).astype(dtype)
        w2 = (jax.random.normal(k_w2, (A, 1), jnp.float32) * 0.1).astype(dtype)
        return w1, b1, w2

    def run_case(batch, D, A=16, dtype=jnp.float32, **kw):
        key = jax.random.PRNGKey(0)
        k1, k2, kp = jax.random.split(key, 3)
        x1 = jax.random.normal(k1, (batch, D), jnp.float32).astype(dtype)
        x2 = jax.random.normal(k2, (batch, D), jnp.float32).astype(dtype)
        w1, b1, w2 = make_params(kp, D, A, dtype)
        ref = bridge_reference(x1, x2, w1, b1, w2)
        out = jax.block_until_ready(
            bridge_attention_pooling(x1, x2, w1, b1, w2, **kw))
        assert out.shape == ref.shape and out.dtype == ref.dtype
        assert jnp.allclose(out.astype(jnp.float32), ref.astype(jnp.float32),
                            atol=1e-5, rtol=1e-5), "mismatch vs reference"

    # 1) Module-spec sized input (8x32): small -> fused jnp fast path.
    run_case(batch=8, D=32)
    # 2) Forced Pallas path: lane-dense (16, 2048) f32 block, single grid step.
    run_case(batch=512, D=64, force_pallas=True)
    # 3) Forced Pallas path in bf16 (16-row sublane packing / min-tile rules).
    run_case(batch=512, D=64, dtype=jnp.bfloat16, force_pallas=True)
    # 4) Forced Pallas path with donated x1 buffer (input_output_aliases={0:0}).
    run_case(batch=512, D=64, force_pallas=True, donate_x1=True)
    # 5) Natural Pallas path: cdiv grid with multiple steps and a ragged tail.
    run_case(batch=9600, D=96)
    # 6) Element count not a multiple of 128 -> jnp fallback (no pad copy).
    run_case(batch=100, D=24)

    print("KERNEL_OK")
</pallas_src>

<mosaic_0001>
module attributes {stable_mosaic.version = 11 : i64} {
  func.func @_bridge_add_kernel(%arg0: i32, %arg1: memref<16x2048xf32, #tpu.memory_space<vmem>>, %arg2: memref<16x2048xf32, #tpu.memory_space<vmem>>, %arg3: memref<16x2048xf32, #tpu.memory_space<vmem>>) attributes {dimension_semantics = [#tpu.dimension_semantics<parallel>], iteration_bounds = array<i64: 1>, scalar_prefetch = 0 : i64, scratch_operands = 0 : i64, tpu.core_type = #tpu.core_type<tc>, window_params = [{transform_indices = @transform_0, window_bounds = array<i64: 16, 2048>}, {transform_indices = @transform_1, window_bounds = array<i64: 16, 2048>}, {transform_indices = @transform_2, window_bounds = array<i64: 16, 2048>}]} {
    %c0 = arith.constant 0 : index
    %c0_0 = arith.constant 0 : index
    %0 = vector.load %arg1[%c0, %c0_0] : memref<16x2048xf32, #tpu.memory_space<vmem>>, vector<16x2048xf32>
    %c0_1 = arith.constant 0 : index
    %c0_2 = arith.constant 0 : index
    %1 = vector.load %arg2[%c0_1, %c0_2] : memref<16x2048xf32, #tpu.memory_space<vmem>>, vector<16x2048xf32>
    %2 = arith.addf %0, %1 : vector<16x2048xf32>
    %c0_3 = arith.constant 0 : index
    %c0_4 = arith.constant 0 : index
    %3 = vector.load %arg3[%c0_3, %c0_4] : memref<16x2048xf32, #tpu.memory_space<vmem>>, vector<16x2048xf32>
    tpu.vector_store %arg3[%c0_3, %c0_4], %2 {strides = array<i32>} : memref<16x2048xf32, #tpu.memory_space<vmem>>, vector<16x2048xf32>,
    return
  }
  func.func @transform_0(%arg0: i32) -> (i32, i32) {
    %c0_i32 = arith.constant 0 : i32
    %c0_i32_0 = arith.constant 0 : i32
    return %arg0, %c0_i32 : i32, i32
  }
  func.func @transform_1(%arg0: i32) -> (i32, i32) {
    %c0_i32 = arith.constant 0 : i32
    %c0_i32_0 = arith.constant 0 : i32
    return %arg0, %c0_i32 : i32, i32
  }
  func.func @transform_2(%arg0: i32) -> (i32, i32) {
    %c0_i32 = arith.constant 0 : i32
    %c0_i32_0 = arith.constant 0 : i32
    return %arg0, %c0_i32 : i32, i32
  }
}

</mosaic_0001>

<bundles_post_ra>
// kernel: tpu_custom_call.1
= control target key start
LH: loop header
LB: loop body
LE: loop exit
PB: predicated region body
PF: predicated region fallthrough
CT: control target
= control target key end

     0   :  { %7 = vsyncpa [#allocation3], 0  ;;  %s295_s0 = inlined_call_operand.hbm [shape: f32[16,2048], index: 0, kind: input, shape index: {}]   ;;  %s296_s1 = inlined_call_operand.hbm [shape: f32[16,2048], index: 1, kind: input, shape index: {}]   ;;  %s297_s2 = inlined_call_operand.hbm [shape: f32[16,2048], index: 2, kind: output, shape index: {}]  }
   0x1   :  { %8 = vsyncpa [#allocation6], 0 }
   0x2   :  { %9 = vsyncpa [#allocation4], 0  ;;  %s257_s9 = smov [#allocation2]  }
   0x3   :  { %s15_s10 = sshll.u32 %s257_s9, 4  ;;  %s16_s10 = int_to_ptr.vmem [resolvable:$true] %s15_s10 }
   0x4   :  { %s199_s11 = scalar_lea.vmem %s16_s10, 4096  ;;  %p204_p1 = scmp.lt.s32.totalorder %s16_s10, %s16_s10 }
   0x5   :  { %p200_p0 = scmp.ne.s32.totalorder %s16_s10, %s199_s11  ;;  %p205_p2 = scmp.lt.s32.totalorder %s199_s11, %s199_s11 }
   0x7   :  { %p206_p3 = por %p205_p2, %p204_p1 }
   0x9   :  { %p207_p4 = pnand %p206_p3, %p200_p0 }
   0xb   :  { %210 = shalt.err (!%p207_p4)
}
   0xc   :  { %s258_s12 = smov 2048   ;;  %s259_s13 = smov 128  }
   0xd   :  { %21 = dma.hbm_to_vmem [thread:$0]  %s295_s0, 4096, %s16_s10, [#allocation3], %s258_s12, %s258_s12, %s259_s13  }
   0xe   :  { %s260_s16 = smov [#allocation5]  }
   0xf   :  { %s27_s17 = sshll.u32 %s260_s16, 4  ;;  %s28_s17 = int_to_ptr.vmem [resolvable:$true] %s27_s17 }
  0x10   :  { %s219_s18 = scalar_lea.vmem %s28_s17, 4096  ;;  %p224_p6 = scmp.lt.s32.totalorder %s28_s17, %s28_s17 }
  0x11   :  { %p220_p5 = scmp.ne.s32.totalorder %s28_s17, %s219_s18  ;;  %p225_p7 = scmp.lt.s32.totalorder %s219_s18, %s219_s18 }
  0x13   :  { %p226_p8 = por %p225_p7, %p224_p6 }
  0x15   :  { %p227_p9 = pnand %p226_p8, %p220_p5 }
  0x17   :  { %230 = shalt.err (!%p227_p9)
}
  0x18   :  { %33 = dma.hbm_to_vmem [thread:$0]  %s296_s1, 4096, %s28_s17, [#allocation6], %s258_s12, %s258_s12, %s259_s13  }
  0x19   :  { %251 = dma.done.wait [#allocation3], 4096  }
  0x1a   :  { %252 = vsyncadd [#allocation3], 4294963200 }
  0x1b   :  { %253 = dma.done.wait [#allocation6], 4096  }
  0x1c   :  { %254 = vsyncadd [#allocation6], 4294963200  ;;  %v40_v0 = vld [vmem:[#allocation2] sm:$0xff]  ;;  %v41_v2 = vld [vmem:[#allocation2 + $0x8] sm:$0xff]  ;;  %s261_s0 = smov [#allocation7]  }
  0x1d   :  { %v72_v1 = vld [vmem:[#allocation5] sm:$0xff]  ;;  %v73_v4 = vld [vmem:[#allocation5 + $0x8] sm:$0xff]  ;;  %v42_v5 = vld [vmem:[#allocation2 + $0x10] sm:$0xff]  ;;  %s173_s1 = sshll.u32 %s261_s0, 4  ;;  %s174_s1 = int_to_ptr.vmem [resolvable:$true] %s173_s1 }
  0x1e   :  { %v104_v3 = vadd.f32 %v72_v1, %v40_v0  ;;  %v74_v6 = vld [vmem:[#allocation5 + $0x10] sm:$0xff]  ;;  %v105_v7 = vadd.f32 %v73_v4, %v41_v2  ;;  %v43_v9 = vld [vmem:[#allocation2 + $0x18] sm:$0xff]  ;;  %v44_v11 = vld [vmem:[#allocation2 + $0x20] sm:$0xff]  ;;  %s231_s21 = scalar_lea.vmem %s174_s1, 4096  ;;  %p236_p11 = scmp.lt.s32.totalorder %s174_s1, %s174_s1 }
  0x1f   :  { %v106_v8 = vadd.f32 %v74_v6, %v42_v5  ;;  %v75_v10 = vld [vmem:[#allocation5 + $0x18] sm:$0xff]  ;;  %v76_v13 = vld [vmem:[#allocation5 + $0x20] sm:$0xff]  ;;  %v45_v14 = vld [vmem:[#allocation2 + $0x28] sm:$0xff]  ;;  %p232_p10 = scmp.ne.s32.totalorder %s174_s1, %s231_s21  ;;  %p237_p12 = scmp.lt.s32.totalorder %s231_s21, %s231_s21 }
  0x20   :  { %136 = vst [vmem:[#allocation7] sm:$0xff] %v104_v3  ;;  %v107_v12 = vadd.f32 %v75_v10, %v43_v9  ;;  %v77_v15 = vld [vmem:[#allocation5 + $0x28] sm:$0xff]  ;;  %137 = vst [vmem:[#allocation7 + $0x8] sm:$0xff] %v105_v7  ;;  %v108_v16 = vadd.f32 %v76_v13, %v44_v11  ;;  %v46_v18 = vld [vmem:[#allocation2 + $0x30] sm:$0xff] }
  0x21   :  { %138 = vst [vmem:[#allocation7 + $0x10] sm:$0xff] %v106_v8  ;;  %v109_v17 = vadd.f32 %v77_v15, %v45_v14  ;;  %v78_v19 = vld [vmem:[#allocation5 + $0x30] sm:$0xff]  ;;  %v47_v20 = vld [vmem:[#allocation2 + $0x38] sm:$0xff]  ;;  %v48_v23 = vld [vmem:[#allocation2 + $0x40] sm:$0xff]  ;;  %p238_p13 = por %p237_p12, %p236_p11 }
  0x22   :  { %139 = vst [vmem:[#allocation7 + $0x18] sm:$0xff] %v107_v12  ;;  %v110_v21 = vadd.f32 %v78_v19, %v46_v18  ;;  %v79_v22 = vld [vmem:[#allocation5 + $0x38] sm:$0xff]  ;;  %v80_v24 = vld [vmem:[#allocation5 + $0x40] sm:$0xff]  ;;  %140 = vst [vmem:[#allocation7 + $0x20] sm:$0xff] %v108_v16 }
  0x23   :  { %141 = vst [vmem:[#allocation7 + $0x28] sm:$0xff] %v109_v17  ;;  %v111_v25 = vadd.f32 %v79_v22, %v47_v20  ;;  %v112_v26 = vadd.f32 %v80_v24, %v48_v23  ;;  %v49_v27 = vld [vmem:[#allocation2 + $0x48] sm:$0xff]  ;;  %v50_v29 = vld [vmem:[#allocation2 + $0x50] sm:$0xff]  ;;  %v51_v32 = vld [vmem:[#allocation2 + $0x58] sm:$0xff]  ;;  %p239_p0 = pnand %p238_p13, %p232_p10 }
  0x24   :  { %v81_v28 = vld [vmem:[#allocation5 + $0x48] sm:$0xff]  ;;  %142 = vst [vmem:[#allocation7 + $0x30] sm:$0xff] %v110_v21  ;;  %v82_v31 = vld [vmem:[#allocation5 + $0x50] sm:$0xff]  ;;  %v83_v33 = vld [vmem:[#allocation5 + $0x58] sm:$0xff] }
  0x25   :  { %v113_v30 = vadd.f32 %v81_v28, %v49_v27  ;;  %143 = vst [vmem:[#allocation7 + $0x38] sm:$0xff] %v111_v25  ;;  %144 = vst [vmem:[#allocation7 + $0x40] sm:$0xff] %v112_v26  ;;  %v114_v34 = vadd.f32 %v82_v31, %v50_v29  ;;  %v115_v35 = vadd.f32 %v83_v33, %v51_v32  ;;  %v52_v36 = vld [vmem:[#allocation2 + $0x60] sm:$0xff]  ;;  %v53_v38 = vld [vmem:[#allocation2 + $0x68] sm:$0xff] }
  0x26   :  { %v84_v37 = vld [vmem:[#allocation5 + $0x60] sm:$0xff]  ;;  %v85_v40 = vld [vmem:[#allocation5 + $0x68] sm:$0xff]  ;;  %v54_v41 = vld [vmem:[#allocation2 + $0x70] sm:$0xff] }
  0x27   :  { %145 = vst [vmem:[#allocation7 + $0x48] sm:$0xff] %v113_v30  ;;  %v116_v39 = vadd.f32 %v84_v37, %v52_v36  ;;  %v86_v42 = vld [vmem:[#allocation5 + $0x70] sm:$0xff]  ;;  %146 = vst [vmem:[#allocation7 + $0x50] sm:$0xff] %v114_v34  ;;  %v117_v43 = vadd.f32 %v85_v40, %v53_v38  ;;  %v55_v45 = vld [vmem:[#allocation2 + $0x78] sm:$0xff] }
  0x28   :  { %147 = vst [vmem:[#allocation7 + $0x58] sm:$0xff] %v115_v35  ;;  %v118_v44 = vadd.f32 %v86_v42, %v54_v41  ;;  %v87_v46 = vld [vmem:[#allocation5 + $0x78] sm:$0xff]  ;;  %v56_v47 = vld [vmem:[#allocation2 + $0x80] sm:$0xff]  ;;  %v57_v50 = vld [vmem:[#allocation2 + $0x88] sm:$0xff] }
  0x29   :  { %148 = vst [vmem:[#allocation7 + $0x60] sm:$0xff] %v116_v39  ;;  %v119_v48 = vadd.f32 %v87_v46, %v55_v45  ;;  %v88_v49 = vld [vmem:[#allocation5 + $0x80] sm:$0xff]  ;;  %v89_v51 = vld [vmem:[#allocation5 + $0x88] sm:$0xff]  ;;  %149 = vst [vmem:[#allocation7 + $0x68] sm:$0xff] %v117_v43 }
  0x2a   :  { %150 = vst [vmem:[#allocation7 + $0x70] sm:$0xff] %v118_v44  ;;  %v120_v52 = vadd.f32 %v88_v49, %v56_v47  ;;  %v121_v53 = vadd.f32 %v89_v51, %v57_v50  ;;  %v58_v54 = vld [vmem:[#allocation2 + $0x90] sm:$0xff]  ;;  %v59_v56 = vld [vmem:[#allocation2 + $0x98] sm:$0xff]  ;;  %v60_v59 = vld [vmem:[#allocation2 + $0xa0] sm:$0xff] }
  0x2b   :  { %v90_v55 = vld [vmem:[#allocation5 + $0x90] sm:$0xff]  ;;  %151 = vst [vmem:[#allocation7 + $0x78] sm:$0xff] %v119_v48  ;;  %v91_v58 = vld [vmem:[#allocation5 + $0x98] sm:$0xff]  ;;  %v92_v60 = vld [vmem:[#allocation5 + $0xa0] sm:$0xff] }
  0x2c   :  { %v122_v57 = vadd.f32 %v90_v55, %v58_v54  ;;  %152 = vst [vmem:[#allocation7 + $0x80] sm:$0xff] %v120_v52  ;;  %153 = vst [vmem:[#allocation7 + $0x88] sm:$0xff] %v121_v53  ;;  %v123_v61 = vadd.f32 %v91_v58, %v59_v56  ;;  %v124_v62 = vadd.f32 %v92_v60, %v60_v59  ;;  %v61_v63 = vld [vmem:[#allocation2 + $0xa8] sm:$0xff]  ;;  %v62_v1 = vld [vmem:[#allocation2 + $0xb0] sm:$0xff] }
  0x2d   :  { %v93_v0 = vld [vmem:[#allocation5 + $0xa8] sm:$0xff]  ;;  %v94_v3 = vld [vmem:[#allocation5 + $0xb0] sm:$0xff]  ;;  %v63_v4 = vld [vmem:[#allocation2 + $0xb8] sm:$0xff] }
  0x2e   :  { %154 = vst [vmem:[#allocation7 + $0x90] sm:$0xff] %v122_v57  ;;  %v125_v2 = vadd.f32 %v93_v0, %v61_v63  ;;  %v95_v5 = vld [vmem:[#allocation5 + $0xb8] sm:$0xff]  ;;  %155 = vst [vmem:[#allocation7 + $0x98] sm:$0xff] %v123_v61  ;;  %v126_v6 = vadd.f32 %v94_v3, %v62_v1  ;;  %v64_v8 = vld [vmem:[#allocation2 + $0xc0] sm:$0xff] }
  0x2f   :  { %156 = vst [vmem:[#allocation7 + $0xa0] sm:$0xff] %v124_v62  ;;  %v127_v7 = vadd.f32 %v95_v5, %v63_v4  ;;  %v96_v9 = vld [vmem:[#allocation5 + $0xc0] sm:$0xff]  ;;  %v65_v10 = vld [vmem:[#allocation2 + $0xc8] sm:$0xff]  ;;  %v66_v13 = vld [vmem:[#allocation2 + $0xd0] sm:$0xff] }
  0x30   :  { %157 = vst [vmem:[#allocation7 + $0xa8] sm:$0xff] %v125_v2  ;;  %v128_v11 = vadd.f32 %v96_v9, %v64_v8  ;;  %v97_v12 = vld [vmem:[#allocation5 + $0xc8] sm:$0xff]  ;;  %v98_v14 = vld [vmem:[#allocation5 + $0xd0] sm:$0xff]  ;;  %158 = vst [vmem:[#allocation7 + $0xb0] sm:$0xff] %v126_v6 }
  0x31   :  { %159 = vst [vmem:[#allocation7 + $0xb8] sm:$0xff] %v127_v7  ;;  %v129_v15 = vadd.f32 %v97_v12, %v65_v10  ;;  %v130_v16 = vadd.f32 %v98_v14, %v66_v13  ;;  %v67_v17 = vld [vmem:[#allocation2 + $0xd8] sm:$0xff]  ;;  %v68_v19 = vld [vmem:[#allocation2 + $0xe0] sm:$0xff]  ;;  %v69_v22 = vld [vmem:[#allocation2 + $0xe8] sm:$0xff] }
  0x32   :  { %v99_v18 = vld [vmem:[#allocation5 + $0xd8] sm:$0xff]  ;;  %160 = vst [vmem:[#allocation7 + $0xc0] sm:$0xff] %v128_v11  ;;  %v100_v21 = vld [vmem:[#allocation5 + $0xe0] sm:$0xff]  ;;  %v101_v23 = vld [vmem:[#allocation5 + $0xe8] sm:$0xff] }
  0x33   :  { %v131_v20 = vadd.f32 %v99_v18, %v67_v17  ;;  %161 = vst [vmem:[#allocation7 + $0xc8] sm:$0xff] %v129_v15  ;;  %162 = vst [vmem:[#allocation7 + $0xd0] sm:$0xff] %v130_v16  ;;  %v132_v24 = vadd.f32 %v100_v21, %v68_v19  ;;  %v133_v25 = vadd.f32 %v101_v23, %v69_v22  ;;  %v70_v26 = vld [vmem:[#allocation2 + $0xf0] sm:$0xff]  ;;  %v71_v28 = vld [vmem:[#allocation2 + $0xf8] sm:$0xff] }
  0x34   :  { %v102_v27 = vld [vmem:[#allocation5 + $0xf0] sm:$0xff]  ;;  %v103_v30 = vld [vmem:[#allocation5 + $0xf8] sm:$0xff] }
  0x35   :  { %163 = vst [vmem:[#allocation7 + $0xd8] sm:$0xff] %v131_v20  ;;  %v134_v29 = vadd.f32 %v102_v27, %v70_v26  ;;  %164 = vst [vmem:[#allocation7 + $0xe0] sm:$0xff] %v132_v24  ;;  %v135_v31 = vadd.f32 %v103_v30, %v71_v28 }
  0x36   :  { %165 = vst [vmem:[#allocation7 + $0xe8] sm:$0xff] %v133_v25 }
  0x37   :  { %166 = vst [vmem:[#allocation7 + $0xf0] sm:$0xff] %v134_v29  ;;  %167 = vst [vmem:[#allocation7 + $0xf8] sm:$0xff] %v135_v31 }
  0x38   :  { %242 = shalt.err (!%p239_p0)
}
  0x39   :  { %179 = dma.vmem_to_hbm [thread:$0]  %s174_s1, 4096, %s297_s2, [#allocation4], %s258_s12, %s258_s12, %s259_s13  }
  0x3a   :  { %255 = dma.done.wait [#allocation4], 4096  }
  0x3b   :  { %256 = vsyncadd [#allocation4], 4294963200 }
  0x3c   :  { %183 = vsyncpa [#allocation3], 1 }
  0x3d   :  { %184 = vsyncpa [#allocation6], 1 }
  0x3e   :  { %185 = vsyncpa [#allocation4], 1 }

</bundles_post_ra>
